<compile_context>
chip_gen: v7x
topology: tpu7x:2x2x1
jax: 0.10.0
libtpu: 0.0.40
codegen_flags: <defaults>
</compile_context>

<pallas_src>
import jax
import jax.numpy as jnp
from jax.experimental import pallas as pl
from jax.experimental.pallas import tpu as pltpu

_TARGET_BLOCK_BYTES = 2 << 20          # ~2 MiB input block per grid step
_VMEM_LIMIT_BYTES = 32 * 1024 * 1024   # covers 2x(in+out) + f32 temporaries


def _yolo_kernel(p_ref, lane_ref, row_ref, out_ref):
    """p_ref/out_ref: (1, TR, L) with L = nx*C5 (lane-dense).
    lane_ref: (6, L) f32 per-lane constants
        row 0: multiplier   (stride on ch0/1, 0 on ch2/3, 1 on ch>=4)
        row 1: additive off (gx*stride on ch0, 0 elsewhere, 1 on ch5 if nc==1)
        row 2: exp-channel mask (1 on ch2/3)
        row 3/4/5: one-hot masks for ch1 / ch2 / ch3
    row_ref: (TR, 3) f32 per-row constants: [gy*stride, anchor_w*stride,
        anchor_h*stride]."""
    p = p_ref[...].astype(jnp.float32)          # (1, TR, L)
    lane = lane_ref[...]                        # (6, L)
    l_mul = lane[0:1, :]
    l_off = lane[1:2, :]
    l_exp = lane[2:3, :]
    l_ch1 = lane[3:4, :]
    l_ch2 = lane[4:5, :]
    l_ch3 = lane[5:6, :]

    row = row_ref[...]                          # (TR, 3)
    rgy = row[:, 0:1]                           # (TR, 1)
    raw = row[:, 1:2]
    rah = row[:, 2:3]

    # One exp per element; sigmoid derived from it.  Safe at the extremes:
    #   p -> +inf: ex = inf, sig = 1 - 1/inf = 1;  p -> -inf: ex = 0, sig = 0.
    ex = jnp.exp(p)                             # (1, TR, L)
    sig = 1.0 - 1.0 / (1.0 + ex)
    base = jnp.where(l_exp > 0.0, ex, sig)      # (1, TR, L)

    # Lane constants combined with per-row (anchor, gy) constants via two
    # broadcast FMAs -- no iota, no modulo, no nested selects.
    mul = l_mul + raw * l_ch2 + rah * l_ch3     # (TR, L)
    off = l_off + rgy * l_ch1                   # (TR, L)

    out_ref[...] = (base * mul + off).astype(out_ref.dtype)


def _choose_row_tile(R, max_rows, min_row_blocks):
    """Largest row tile that divides R, is a multiple of 8 sublanes (or == R),
    fits the block-byte budget and leaves >= min_row_blocks grid steps."""
    for tr in range(min(R, max_rows), 0, -1):
        if R % tr:
            continue
        if tr % 8 != 0 and tr != R:
            continue
        if (R // tr) < min_row_blocks:
            continue
        return tr
    # Fallback: ragged tail (multiple of 8); correctness preserved by Pallas'
    # masked partial-block writes.
    tr = min(R, max(8, (min(max_rows, pl.cdiv(R, min_row_blocks)) // 8) * 8))
    return tr


def yolo_layer_forward(img, masked_anchors, classes_num, image_size):
    """Eval-mode YOLOLayer.forward.

    img:            [B, A*(classes_num+5), ny, nx]   (NCHW conv output)
    masked_anchors: [A, 2]                           (anchors[anchors_mask])
    image_size:     (H, W) of the network input image
    returns (inference_out[B, A*ny*nx, 5+nc], prediction[B, A, ny, nx, 5+nc])
    """
    B, C, ny, nx = img.shape
    A = masked_anchors.shape[0]
    C5 = classes_num + 5
    assert C == A * C5, "channel count must equal anchors_num*(classes_num+5)"

    stride = float(max(image_size)) / float(max(nx, ny))

    # torch: img.view(B, A, C5, ny, nx).permute(0, 1, 3, 4, 2).contiguous()
    # TODO(synk): still an XLA transpose outside the kernel (see header).
    prediction = img.reshape(B, A, C5, ny, nx).transpose(0, 1, 3, 4, 2)

    # Lane-dense flat view: row = a*ny + gy, lane = gx*C5 + ch.
    R, L = A * ny, nx * C5
    pred2d = prediction.reshape(B, R, L)

    f32 = jnp.float32
    # ---- per-lane constants (depend only on (gx, ch)) -----------------------
    lane_ch = jnp.tile(jnp.arange(C5), nx)                        # (L,) = l % C5
    lane_gx = jnp.repeat(jnp.arange(nx), C5).astype(f32)          # (L,) = l // C5
    l_mul = jnp.where(lane_ch < 2, stride,
                      jnp.where(lane_ch < 4, 0.0, 1.0)).astype(f32)
    l_off = jnp.where(lane_ch == 0, lane_gx * stride, 0.0).astype(f32)
    l_exp = ((lane_ch == 2) | (lane_ch == 3)).astype(f32)
    l_ch1 = (lane_ch == 1).astype(f32)
    l_ch2 = (lane_ch == 2).astype(f32)
    l_ch3 = (lane_ch == 3).astype(f32)
    if classes_num == 1:
        # torch: inference_out[..., 5] = 1
        l_mul = jnp.where(lane_ch == 5, 0.0, l_mul)
        l_off = jnp.where(lane_ch == 5, 1.0, l_off)
    lane_tab = jnp.stack([l_mul, l_off, l_exp, l_ch1, l_ch2, l_ch3])  # (6, L)

    # ---- per-row constants (depend only on (a, gy)) -- single (R, 3) table --
    row_a = jnp.repeat(jnp.arange(A), ny)                          # (R,)
    row_gy = jnp.tile(jnp.arange(ny), A).astype(f32)               # (R,)
    anchor_vec = masked_anchors.astype(f32) / stride               # (A, 2)
    row_tab = jnp.stack(
        [row_gy * stride,
         (anchor_vec[:, 0] * stride)[row_a],
         (anchor_vec[:, 1] * stride)[row_a]],
        axis=-1)                                                   # (R, 3)

    # ---- tiling: ~2 MiB row chunks, even division of R, >= 2 total steps ----
    bytes_per_row = L * img.dtype.itemsize
    max_rows = max(8, _TARGET_BLOCK_BYTES // max(bytes_per_row, 1))
    min_row_blocks = 2 if B < 2 else 1          # keep both v7x TCs busy
    TR = _choose_row_tile(R, max_rows, min_row_blocks)
    NR = pl.cdiv(R, TR)

    numel = B * R * L
    cost = pl.CostEstimate(
        flops=8 * numel,
        transcendentals=2 * numel,
        bytes_accessed=2 * numel * img.dtype.itemsize,
    )

    out2d = pl.pallas_call(
        _yolo_kernel,
        out_shape=jax.ShapeDtypeStruct((B, R, L), img.dtype),
        grid=(B, NR),
        in_specs=[
            pl.BlockSpec((1, TR, L), lambda b, r: (b, r, 0)),   # prediction view
            pl.BlockSpec((6, L), lambda b, r: (0, 0)),          # lane constants
            pl.BlockSpec((TR, 3), lambda b, r: (r, 0)),         # row constants
        ],
        out_specs=pl.BlockSpec((1, TR, L), lambda b, r: (b, r, 0)),
        compiler_params=pltpu.CompilerParams(
            dimension_semantics=("parallel", "parallel"),
            vmem_limit_bytes=_VMEM_LIMIT_BYTES),
        cost_estimate=cost,
    )(pred2d, lane_tab, row_tab)

    # torch: inference_out.view(batch_size, -1, 5 + classes_num)  (free reshape)
    inference_out = out2d.reshape(B, A * ny * nx, C5)
    return inference_out, prediction


def yolo_layer_forward_ref(img, masked_anchors, classes_num, image_size):
    """Pure-JAX reference of the same forward (for correctness check)."""
    B, C, ny, nx = img.shape
    A = masked_anchors.shape[0]
    C5 = classes_num + 5
    stride = float(max(image_size)) / float(max(nx, ny))
    pred = img.reshape(B, A, C5, ny, nx).transpose(0, 1, 3, 4, 2)
    yv, xv = jnp.meshgrid(jnp.arange(ny), jnp.arange(nx), indexing="ij")
    grid_xy = jnp.stack([xv, yv], axis=-1).astype(img.dtype).reshape(1, 1, ny, nx, 2)
    anchor_wh = (masked_anchors.astype(img.dtype) / stride).reshape(1, A, 1, 1, 2)
    xy = (jax.nn.sigmoid(pred[..., 0:2]) + grid_xy) * stride
    wh = jnp.exp(pred[..., 2:4]) * anchor_wh * stride
    rest = jax.nn.sigmoid(pred[..., 4:])
    out = jnp.concatenate([xy, wh, rest], axis=-1)
    if classes_num == 1:
        out = out.at[..., 5].set(1.0)
    return out.reshape(B, -1, C5), pred


if __name__ == "__main__":
    key = jax.random.PRNGKey(0)

    # Module config (deterministic, small): standard YOLOv3-style anchors.
    classes_num = 3
    anchors = [(10, 13), (16, 30), (33, 23), (30, 61), (62, 45),
               (59, 119), (116, 90), (156, 198), (373, 326)]
    anchors_mask = [3, 4, 5]
    image_size = (64, 64)      # network input size -> stride = 64/16 = 4
    onnx_stride = 4            # unused (non-onnx path)

    A = len(anchors_mask)
    B, ny, nx = 2, 16, 16
    C = A * (classes_num + 5)  # 24

    img = jax.random.normal(key, (B, C, ny, nx), dtype=jnp.float32)
    masked = jnp.array([anchors[i] for i in anchors_mask], dtype=jnp.float32)

    out, pred = yolo_layer_forward(img, masked, classes_num, image_size)
    jax.block_until_ready((out, pred))

    ref_out, ref_pred = yolo_layer_forward_ref(img, masked, classes_num, image_size)
    assert out.shape == (B, A * ny * nx, classes_num + 5)
    assert pred.shape == (B, A, ny, nx, classes_num + 5)
    assert jnp.allclose(out, ref_out, atol=1e-5, rtol=1e-5), \
        float(jnp.max(jnp.abs(out - ref_out)))
    assert jnp.allclose(pred, ref_pred)

    print("KERNEL_OK")
</pallas_src>

<mosaic_0001>
module attributes {stable_mosaic.version = 11 : i64} {
  func.func @_yolo_kernel(%arg0: i32, %arg1: i32, %arg2: memref<1x48x128xf32, #tpu.memory_space<vmem>>, %arg3: memref<6x128xf32, #tpu.memory_space<vmem>>, %arg4: memref<48x3xf32, #tpu.memory_space<vmem>>, %arg5: memref<1x48x128xf32, #tpu.memory_space<vmem>>) attributes {dimension_semantics = [#tpu.dimension_semantics<parallel>, #tpu.dimension_semantics<parallel>], iteration_bounds = array<i64: 2, 1>, scalar_prefetch = 0 : i64, scratch_operands = 0 : i64, tpu.core_type = #tpu.core_type<tc>, window_params = [{transform_indices = @transform_0, window_bounds = array<i64: 1, 48, 128>}, {pipeline_mode = #tpu.pipeline_mode<synchronous>, transform_indices = @transform_1, window_bounds = array<i64: 6, 128>}, {transform_indices = @transform_2, window_bounds = array<i64: 48, 3>}, {transform_indices = @transform_3, window_bounds = array<i64: 1, 48, 128>}]} {
    %c0 = arith.constant 0 : index
    %c0_0 = arith.constant 0 : index
    %c0_1 = arith.constant 0 : index
    %0 = vector.load %arg2[%c0, %c0_0, %c0_1] : memref<1x48x128xf32, #tpu.memory_space<vmem>>, vector<1x48x128xf32>
    %c0_2 = arith.constant 0 : index
    %c0_3 = arith.constant 0 : index
    %1 = vector.load %arg3[%c0_2, %c0_3] : memref<6x128xf32, #tpu.memory_space<vmem>>, vector<6x128xf32>
    %2 = vector.extract_strided_slice %1 {offsets = [0, 0], sizes = [1, 128], strides = [1, 1]} : vector<6x128xf32> to vector<1x128xf32>
    %3 = vector.extract_strided_slice %1 {offsets = [1, 0], sizes = [1, 128], strides = [1, 1]} : vector<6x128xf32> to vector<1x128xf32>
    %4 = vector.extract_strided_slice %1 {offsets = [2, 0], sizes = [1, 128], strides = [1, 1]} : vector<6x128xf32> to vector<1x128xf32>
    %5 = vector.extract_strided_slice %1 {offsets = [3, 0], sizes = [1, 128], strides = [1, 1]} : vector<6x128xf32> to vector<1x128xf32>
    %6 = vector.extract_strided_slice %1 {offsets = [4, 0], sizes = [1, 128], strides = [1, 1]} : vector<6x128xf32> to vector<1x128xf32>
    %7 = vector.extract_strided_slice %1 {offsets = [5, 0], sizes = [1, 128], strides = [1, 1]} : vector<6x128xf32> to vector<1x128xf32>
    %c0_4 = arith.constant 0 : index
    %c0_5 = arith.constant 0 : index
    %8 = vector.load %arg4[%c0_4, %c0_5] : memref<48x3xf32, #tpu.memory_space<vmem>>, vector<48x3xf32>
    %9 = vector.extract_strided_slice %8 {offsets = [0, 0], sizes = [48, 1], strides = [1, 1]} : vector<48x3xf32> to vector<48x1xf32>
    %10 = vector.extract_strided_slice %8 {offsets = [0, 1], sizes = [48, 1], strides = [1, 1]} : vector<48x3xf32> to vector<48x1xf32>
    %11 = vector.extract_strided_slice %8 {offsets = [0, 2], sizes = [48, 1], strides = [1, 1]} : vector<48x3xf32> to vector<48x1xf32>
    %12 = math.exp %0 : vector<1x48x128xf32>
    %cst = arith.constant 1.000000e+00 : f32
    %13 = vector.broadcast %cst : f32 to vector<1x48x128xf32>
    %14 = arith.addf %13, %12 : vector<1x48x128xf32>
    %cst_6 = arith.constant 1.000000e+00 : f32
    %15 = vector.broadcast %cst_6 : f32 to vector<1x48x128xf32>
    %16 = arith.divf %15, %14 : vector<1x48x128xf32>
    %cst_7 = arith.constant 1.000000e+00 : f32
    %17 = vector.broadcast %cst_7 : f32 to vector<1x48x128xf32>
    %18 = arith.subf %17, %16 : vector<1x48x128xf32>
    %cst_8 = arith.constant 0.000000e+00 : f32
    %19 = vector.broadcast %cst_8 : f32 to vector<1x128xf32>
    %20 = arith.cmpf ogt, %4, %19 : vector<1x128xf32>
    %21 = vector.shape_cast %20 : vector<1x128xi1> to vector<1x1x128xi1>
    %22 = vector.broadcast %21 : vector<1x1x128xi1> to vector<1x48x128xi1>
    %23 = arith.select %22, %12, %18 : vector<1x48x128xi1>, vector<1x48x128xf32>
    %24 = vector.broadcast %10 : vector<48x1xf32> to vector<48x128xf32>
    %25 = vector.broadcast %6 : vector<1x128xf32> to vector<48x128xf32>
    %26 = arith.mulf %24, %25 : vector<48x128xf32>
    %27 = vector.broadcast %2 : vector<1x128xf32> to vector<48x128xf32>
    %28 = arith.addf %27, %26 : vector<48x128xf32>
    %29 = vector.broadcast %11 : vector<48x1xf32> to vector<48x128xf32>
    %30 = vector.broadcast %7 : vector<1x128xf32> to vector<48x128xf32>
    %31 = arith.mulf %29, %30 : vector<48x128xf32>
    %32 = arith.addf %28, %31 : vector<48x128xf32>
    %33 = vector.broadcast %9 : vector<48x1xf32> to vector<48x128xf32>
    %34 = vector.broadcast %5 : vector<1x128xf32> to vector<48x128xf32>
    %35 = arith.mulf %33, %34 : vector<48x128xf32>
    %36 = vector.broadcast %3 : vector<1x128xf32> to vector<48x128xf32>
    %37 = arith.addf %36, %35 : vector<48x128xf32>
    %38 = vector.shape_cast %32 : vector<48x128xf32> to vector<1x48x128xf32>
    %39 = arith.mulf %23, %38 : vector<1x48x128xf32>
    %40 = vector.shape_cast %37 : vector<48x128xf32> to vector<1x48x128xf32>
    %41 = arith.addf %39, %40 : vector<1x48x128xf32>
    %c0_9 = arith.constant 0 : index
    %c0_10 = arith.constant 0 : index
    %c0_11 = arith.constant 0 : index
    %42 = vector.load %arg5[%c0_9, %c0_10, %c0_11] : memref<1x48x128xf32, #tpu.memory_space<vmem>>, vector<1x48x128xf32>
    tpu.vector_store %arg5[%c0_9, %c0_10, %c0_11], %41 {strides = array<i32>} : memref<1x48x128xf32, #tpu.memory_space<vmem>>, vector<1x48x128xf32>,
    return
  }
  func.func @transform_0(%arg0: i32, %arg1: i32) -> (i32, i32, i32) {
    %c0_i32 = arith.constant 0 : i32
    %c0_i32_0 = arith.constant 0 : i32
    return %arg0, %arg1, %c0_i32 : i32, i32, i32
  }
  func.func @transform_1(%arg0: i32, %arg1: i32) -> (i32, i32) {
    %c0_i32 = arith.constant 0 : i32
    %c0_i32_0 = arith.constant 0 : i32
    %c0_i32_1 = arith.constant 0 : i32
    return %c0_i32, %c0_i32_0 : i32, i32
  }
  func.func @transform_2(%arg0: i32, %arg1: i32) -> (i32, i32) {
    %c0_i32 = arith.constant 0 : i32
    %c0_i32_0 = arith.constant 0 : i32
    return %arg1, %c0_i32 : i32, i32
  }
  func.func @transform_3(%arg0: i32, %arg1: i32) -> (i32, i32, i32) {
    %c0_i32 = arith.constant 0 : i32
    %c0_i32_0 = arith.constant 0 : i32
    return %arg0, %arg1, %c0_i32 : i32, i32, i32
  }
}

</mosaic_0001>

<bundles_post_ra>
// kernel: tpu_custom_call.1
= control target key start
LH: loop header
LB: loop body
LE: loop exit
PB: predicated region body
PF: predicated region fallthrough
CT: control target
= control target key end

     0   :  { %8 = vsyncpa [#allocation3], 0  ;;  %s1096_s0 = inlined_call_operand.hbm [shape: f32[2,48,128], index: 0, kind: input, shape index: {}]   ;;  %s1097_s1 = inlined_call_operand.vmem [shape: f32[6,128], index: 1, kind: input, shape index: {}]   ;;  %s1098_s2 = inlined_call_operand.vmem [shape: f32[48,3], index: 2, kind: input, shape index: {}]   ;;  %s1099_s3 = inlined_call_operand.hbm [shape: f32[2,48,128], index: 3, kind: output, shape index: {}]  }
   0x1   :  { %10 = vsyncpa [#allocation3 + $0x1], 0 }
   0x2   :  { %11 = vsyncpa [#allocation4], 0 }
   0x3   :  { %13 = vsyncpa [#allocation4 + $0x1], 0  ;;  %s819_s12 = smov 0   ;;  %s821_s13 = smov 0  }
   0x4   :  { %s823_s14 = smov 0   ;;  %s825_s15 = smov 0  }
   0x5   :  { %s827_s16 = smov 0   ;;  %s829_s17 = smov 0  }
   0x6 LB: > { %s563_s18 = sadd.s32 4294967295, %s788_s17   ;;  %s564_s19 = sadd.s32 4294967294, %s788_s17   ;;  %s788_s17 = sphi %s829_s17, %s19_s17   ;;  %s784_s16 = sphi %s827_s16, %s1114_s16   ;;  %s780_s15 = sphi %s825_s15, %s1113_s15   ;;  %s776_s14 = sphi %s823_s14, %s1112_s14   ;;  %s772_s13 = sphi %s821_s13, %s1111_s13   ;;  %s768_s12 = sphi %s819_s12, %s1110_s12  }
   0x7   : > { %s31_s20 = sadd.s32 1, %s784_s16  ;;  %s40_s21 = sadd.s32 1, %s776_s14 }
   0x8   : > { %p33_p0 = scmp.ge.s32.totalorder %s31_s20, 2  ;;  %p47_p1 = scmp.ne.s32.totalorder %s776_s14, %s772_s13 }
   0x9   : > { %p48_p2 = scmp.eq.s32.totalorder %s788_s17, 0  ;;  %p53_p3 = scmp.ne.s32.totalorder %s772_s13, %s768_s12 }
   0xa   : > { %s1116_s20 = smov (%p33_p0, %s31_s20), 0  ;;  %p54_p5 = scmp.eq.s32.totalorder %s563_s18, 0 }
   0xb   : > { %p860_p4 = por %p48_p2, %p47_p1  ;;  %s35_s23 = ssub.s32 %s784_s16, %s1116_s20 }
   0xc   : > { %p126_p6 = scmp.eq.s32.totalorder %s563_s18, 1  ;;  %p38_p7 = scmp.eq.s32.totalorder %s35_s23, 0 }
   0xd   : > { %p866_p8 = por %p54_p5, %p53_p3  ;;  %p132_p10 = scmp.eq.s32.totalorder %s564_s19, 1 }
   0xe   : > { %p870_p9 = por %p126_p6, %p47_p1  ;;  %p589_p13 = scmp.lt.s32.totalorder %s788_s17, 2 }
   0xf   : > { %s875_s26 = scalar_select %p38_p7, %s776_s14, %s40_s21  }
  0x10   : > { %s1103_s25 = scalar_select %p870_p9, 1, 0 }
  0x11   : > { %p877_p11 = por %p132_p10, %p53_p3  ;;  %s164_s28 = sand.u32 1, %s776_s14  }
  0x12   : > { %s573_s29 = smul.u32 48, %s164_s28  ;;  %p887_p0 = pnand %p589_p13, %p860_p4 }
  0x13   : > { %s1104_s27 = scalar_select %p877_p11, 1, 0 }
  0x14   : > { %s574_s30 = smul.u32 768, %s784_s16  ;;  %s168_s8 = scalar_lea.vmem [#allocation2], %s573_s29 }
  0x15   : > { %s177_s9 = sshll.u32 %s168_s8, 4  ;;  %s899_s10 = scalar_lea.sflag [#allocation3], %s164_s28  ;;  %s896_s9 = int_to_ptr.vmem [resolvable:$true] %s177_s9 }
  0x16   : > { %s894_s7 = scalar_lea.hbm %s1096_s0, %s574_s30  ;;  %p678_p3 = pneg %p887_p0 }
  0x17   : > { %s676_s11 = scalar_lea.hbm %s894_s7, 768  ;;  %s681_s21 = scalar_lea.hbm %s1096_s0, 1536 }
  0x18   : > { %p677_p2 = scmp.ne.s32.totalorder %s894_s7, %s676_s11  ;;  %p682_p6 = scmp.lt.u32.totalorder %s894_s7, %s1096_s0 }
  0x19   : > { %p683_p7 = scmp.lt.u32.totalorder %s681_s21, %s676_s11  ;;  %p685_p13 = scmp.lt.u32.totalorder %s676_s11, %s894_s7 }
  0x1a   : > { %p679_p4 = pnand %p678_p3, %p677_p2 }
  0x1b   : > { %p684_p10 = por %p683_p7, %p682_p6 }
  0x1c   : > { %p680_p5 = pneg %p679_p4 }
  0x1d   : > { %p686_p12 = por %p685_p13, %p684_p10 }
  0x1f   : > { %p687_p1 = pnand %p686_p12, %p680_p5 }
  0x21   : > { %690 = shalt.err (!%p687_p1)
}
  0x22   : > { %s691_s28 = scalar_lea.vmem %s896_s9, 768  ;;  %s790_s29 = smov [#allocation2]  }
  0x23   : > { %p692_p2 = scmp.ne.s32.totalorder %s896_s9, %s691_s28  ;;  %s696_s30 = sshll.u32 %s790_s29, 4  ;;  %s697_s30 = int_to_ptr.vmem [resolvable:$false] %s696_s30 }
  0x24   : > { %s698_s5 = scalar_lea.vmem %s697_s30, 1536  ;;  %p699_p9 = scmp.lt.s32.totalorder %s896_s9, %s697_s30 }
  0x25   : > { %p694_p4 = pnand %p692_p2, %p678_p3  ;;  %p700_p6 = scmp.lt.s32.totalorder %s698_s5, %s691_s28 }
  0x27   : > { %p695_p11 = pneg %p694_p4  ;;  %p701_p7 = por %p700_p6, %p699_p9 }
  0x29   : > { %p702_p10 = pnand %p701_p7, %p695_p11 }
  0x2b   : > { %705 = shalt.err (!%p702_p10)
}
  0x2c   : > { %s791_s6 = smov 128   ;;  %s792_s8 = smov 8  }
  0x2d   : > { %584 = dma.hbm_to_vmem [thread:$0]  (!%p887_p0), %s894_s7, 768, %s896_s9, %s899_s10, %s791_s6, %s791_s6, %s792_s8  }
  0x2e   : > { %p185_p12 = scmp.lt.s32.totalorder %s788_s17, 3  ;;  %p1106_p1 = scmp.ge.s32.totalorder %s788_s17, 1 }
  0x30   : > { %p186_p3 = pnand %p1106_p1, %p185_p12 }
  0x31   : > { %s931_s11 = sand.u32 (!%p186_p3), 1, %s772_s13  }
  0x32   : > { %189 = sbr.rel (%p186_p3) target bundleno = 247 (0xf7), region = 32  ;;  %s192_s19 = scalar_lea.sflag (!%p186_p3), [#allocation3], %s931_s11 }
  0x33   : > { %s575_s18 = smul.u32 (!%p186_p3), 48, %s931_s11 }
  0x35   : > { %s937_s21 = scalar_lea.vmem (!%p186_p3), [#allocation2], %s575_s18 }
  0x39   : > { %759 = dma.done.wait (%p866_p8), %s192_s19, 768  }
  0x3a   : > { %761 = vsyncadd (%p866_p8), %s192_s19, 4294966528  ;;  %v793_v0 = vmov 1   ;;  %v240_v1 = vld [vmem:[%s1098_s2 + $0x10] sm:$0xff]  ;;  %v238_v2 = vld [vmem:[%s1098_s2] sm:$0xff]  ;;  %v794_v7 = vmov 2   ;;  %v795_v8 = vmov 0   ;;  %v282_v26 = vlaneseq }
  0x3b   : > { %647 = vset.pattern.permute.xlu1 %v793_v0  ;;  %646 = vset.pattern.permute.xlu0 %v793_v0  ;;  %v241_v3 = vld [vmem:[%s1098_s2 + $0x18] sm:$0xff]  ;;  %v239_v4 = vld [vmem:[%s1098_s2 + $0x8] sm:$0xff]  ;;  %v242_v6 = vld [vmem:[%s1098_s2 + $0x20] sm:$0xff]  ;;  %s576_s4 = smul.u32 768, %s780_s15  ;;  %s446_s22 = scalar_lea.sflag [#allocation4], %s931_s11 }
  0x3c   : > { %305 = vperm.xlu1 %647, %v240_v1   ;;  %295 = vperm.xlu0 %646, %v238_v2   ;;  %v243_v5 = vld [vmem:[%s1098_s2 + $0x28] sm:$0xff]  ;;  %v231_v10 = vld [vmem:[%s937_s21] sm:$0xff]  ;;  %v233_v12 = vld [vmem:[%s937_s21 + $0x10] sm:$0xff]  ;;  %v283_v33 = vshrl.u32 %v282_v26, 7  ;;  %p1107_p9 = scmp.ne.s32.totalorder %s1103_s25, 0  ;;  %s796_s23 = smov [#allocation5]  }
  0x3d   : > { %v232_v9 = vld [vmem:[%s937_s21 + $0x8] sm:$0xff]  ;;  %v244_v13 = vmul.f32 1.442695, %v231_v10  ;;  %v235_v14 = vld [vmem:[%s937_s21 + $0x20] sm:$0xff]  ;;  %v248_v15 = vmul.f32 1.442695, %v233_v12  ;;  %s1047_s10 = scalar_lea.hbm %s1099_s3, %s576_s4 }
  0x3e   : > { %v246_v11 = vmul.f32 1.442695, %v232_v9  ;;  %v252_v16 = vmul.f32 1.442695, %v235_v14  ;;  %v234_v17 = vld [vmem:[%s937_s21 + $0x18] sm:$0xff]  ;;  %v236_v19 = vld [vmem:[%s937_s21 + $0x28] sm:$0xff] }
  0x3f   : > { %v250_v18 = vmul.f32 1.442695, %v234_v17  ;;  %v254_v22 = vmul.f32 1.442695, %v236_v19  ;;  %v237_v38 = vld [vmem:[%s1097_s1] sm:$0x3f] }
  0x40   : > { %310 = vperm.xlu1 %647, %v241_v3   ;;  %300 = vperm.xlu0 %646, %v239_v4   ;;  %652 = vpow2.f32 %v246_v11  ;;  %vm280_vm0 = vcmp.gt.f32.partialorder %v237_v38, 0.0  ;;  %v325_v39 = vsub.s32 4, %v283_v33  ;;  %v369_v40 = vsub.s32 5, %v283_v33  ;;  %s222_s21 = scalar_lea.vmem [#allocation5], %s575_s18  ;;  %s710_s28 = sshll.u32 %s796_s23, 4  ;;  %s711_s28 = int_to_ptr.vmem [resolvable:$false] %s710_s28 }
  0x41   : > { %654 = vpow2.f32 %v244_v13  ;;  %v284_v45 = vsub.s32 2, %v283_v33  ;;  %v281_v46 = vsel %vm280_vm0, 1, %v795_v8  ;;  %v335_v47 = vsub.s32 0, %v283_v33  ;;  %s461_s18 = sshll.u32 %s222_s21, 4  ;;  %s712_s24 = scalar_lea.vmem %s711_s28, 1536  ;;  %s1042_s18 = int_to_ptr.vmem [resolvable:$true] %s461_s18 }
  0x42   : > { %656 = vpow2.f32 %v248_v15  ;;  %v326_v48 = vrot.slane %v237_v38, %v325_v39  ;;  %v991_v49 = vrot.slane %v237_v38, %v369_v40  ;;  %v409_v58 = vsub.s32 3, %v283_v33  ;;  %s706_s15 = scalar_lea.vmem %s1042_s18, 768  ;;  %p713_p5 = scmp.lt.s32.totalorder %s1042_s18, %s711_s28 }
  0x43   : > { %658 = vpow2.f32 %v252_v16  ;;  %v994_v54 = vrot.slane %v281_v46, %v284_v45  ;;  %v996_v59 = vrot.slane %v237_v38, %v335_v47  ;;  %p707_p8 = scmp.ne.s32.totalorder %s1042_s18, %s706_s15  ;;  %p714_p13 = scmp.lt.s32.totalorder %s712_s24, %s706_s15 }
  0x44   : > { %320 = vperm.xlu1 %647, %v243_v5   ;;  %315 = vperm.xlu0 %646, %v242_v6   ;;  %660 = vpow2.f32 %v250_v18  ;;  %v1003_v9 = vrot.slane %v237_v38, %v409_v58 }
  0x45   : > { %662 = vpow2.f32 %v254_v22  ;;  %vm286_vm1 = vcmp.eq.s32.totalorder %v994_v54, 1  ;;  %p708_p11 = pnand %p707_p8, %p1107_p9  ;;  %p715_p2 = por %p714_p13, %p713_p5 }
  0x47   : > { %p709_p0 = pneg %p708_p11 }
  0x48   : > { %649 = vset.pattern.permute.xlu1 %v794_v7  ;;  %648 = vset.pattern.permute.xlu0 %v794_v7 }
  0x49   : > { %348 = vperm.xlu1 %649, %v239_v4   ;;  %344 = vperm.xlu0 %648, %v238_v2   ;;  %p716_p4 = pnand %p715_p2, %p709_p0 }
  0x4a   : > { %v967_v23 = vpop.eup %652 }
  0x4b   : > { %v969_v24 = vpop.eup %654  ;;  %v257_v29 = vadd.f32 1.0, %v967_v23 }
  0x4c   : > { %v971_v25 = vpop.eup %656  ;;  %v256_v30 = vadd.f32 1.0, %v969_v24 }
  0x4d   : > { %352 = vperm.xlu1 %649, %v240_v1   ;;  %356 = vperm.xlu0 %648, %v241_v3   ;;  %v977_v31 = vpop.eup %658  ;;  %v258_v32 = vadd.f32 1.0, %v971_v25  ;;  %664 = vrcp.f32 %v257_v29 }
  0x4e   : > { %666 = vrcp.f32 %v256_v30  ;;  %v260_v36 = vadd.f32 1.0, %v977_v31  ;;  %v983_v37 = vpop.eup %660 }
  0x4f   : > { %668 = vrcp.f32 %v258_v32  ;;  %v259_v43 = vadd.f32 1.0, %v983_v37  ;;  %v989_v44 = vpop.eup %662 }
  0x50   : > { %670 = vrcp.f32 %v260_v36  ;;  %v261_v52 = vadd.f32 1.0, %v989_v44 }
  0x51   : > { %360 = vperm.xlu1 %649, %v242_v6   ;;  %364 = vperm.xlu0 %648, %v243_v5   ;;  %672 = vrcp.f32 %v259_v43 }
  0x52   : > { %674 = vrcp.f32 %v261_v52 }
  0x55   : > { %650 = vset.pattern.permute.xlu1 %v795_v8  ;;  %651 = vset.pattern.permute.xlu0 %v795_v8 }
  0x56   : > { %384 = vperm.xlu1 %650, %v238_v2   ;;  %388 = vperm.xlu0 %651, %v239_v4   ;;  %v419_v2 = vsub.s32 1, %v283_v33 }
  0x57   : > { %v665_v53 = vpop.eup %664 }
  0x58   : > { %v667_v56 = vpop.eup %666  ;;  %v275_v62 = vsub.f32 1.0, %v665_v53  ;;  %v420_v16 = vrot.slane %v237_v38, %v419_v2 }
  0x59   : > { %v669_v61 = vpop.eup %668 }
  0x5a   : > { %392 = vperm.xlu1 %650, %v240_v1   ;;  %400 = vperm.xlu0 %651, %v242_v6   ;;  %v671_v6 = vpop.eup %670  ;;  %v276_v11 = vsub.f32 1.0, %v669_v61  ;;  %v288_v13 = vsel %vm286_vm1, %v967_v23, %v275_v62 }
  0x5b   : > { %v673_v26 = vpop.eup %672 }
  0x5c   : > { %v289_v32 = vsel %vm286_vm1, %v971_v25, %v276_v11  ;;  %v675_v25 = vpop.eup %674 }
  0x5e   : > { %396 = vperm.xlu1 %650, %v241_v3  }
  0x62   : > { %404 = vperm.xlu1 %650, %v243_v5   ;;  %v274_v5 = vsub.f32 1.0, %v667_v56 }
  0x64   : > { %v287_v19 = vsel %vm286_vm1, %v969_v24, %v274_v5 }
  0xbb   : > { %v306_v20 = vpop.permute.xlu1 %305  ;;  %v296_v21 = vpop.permute.xlu0 %295 }
  0xbc   : > { %v327_v57 = vmul.f32 %v326_v48, %v296_v21  ;;  %v329_v3 = vmul.f32 %v326_v48, %v306_v20  ;;  %v278_v20 = vsub.f32 1.0, %v671_v6 }
  0xbe   : > { %v337_v7 = vadd.f32 %v996_v59, %v327_v57  ;;  %v339_v17 = vadd.f32 %v996_v59, %v329_v3  ;;  %v279_v57 = vsub.f32 1.0, %v675_v25 }
  0xbf   : > { %v973_v27 = vpop.permute.xlu1 %310  ;;  %v301_v28 = vpop.permute.xlu0 %300 }
  0xc0   : > { %v328_v55 = vmul.f32 %v326_v48, %v301_v28  ;;  %v330_v18 = vmul.f32 %v326_v48, %v973_v27  ;;  %v292_v2 = vsel %vm286_vm1, %v989_v44, %v279_v57 }
  0xc2   : > { %v338_v4 = vadd.f32 %v996_v59, %v328_v55  ;;  %v340_v39 = vadd.f32 %v996_v59, %v330_v18 }
  0xc3   : > { %v980_v34 = vpop.permute.xlu1 %320  ;;  %v316_v35 = vpop.permute.xlu0 %315 }
  0xc4   : > { %v331_v8 = vmul.f32 %v326_v48, %v316_v35  ;;  %v332_v40 = vmul.f32 %v326_v48, %v980_v34 }
  0xc6   : > { %v341_v28 = vadd.f32 %v996_v59, %v331_v8 }
  0xc8   : > { %v349_v41 = vpop.permute.xlu1 %348  ;;  %v345_v42 = vpop.permute.xlu0 %344 }
  0xc9   : > { %v372_v60 = vmul.f32 %v991_v49, %v349_v41  ;;  %v371_v63 = vmul.f32 %v991_v49, %v345_v42  ;;  %v277_v41 = vsub.f32 1.0, %v673_v26  ;;  %v291_v42 = vsel %vm286_vm1, %v977_v31, %v278_v20 }
  0xcb   : > { %v378_v10 = vadd.f32 %v372_v60, %v338_v4  ;;  %v377_v14 = vadd.f32 %v371_v63, %v337_v7  ;;  %v290_v48 = vsel %vm286_vm1, %v983_v37, %v277_v41  ;;  %v342_v60 = vadd.f32 %v996_v59, %v332_v40 }
  0xcc   : > { %v353_v50 = vpop.permute.xlu1 %352  ;;  %v357_v51 = vpop.permute.xlu0 %356 }
  0xcd   : > { %v373_v12 = vmul.f32 %v991_v49, %v353_v50  ;;  %v428_v30 = vmul.f32 %v378_v10, %v288_v13  ;;  %v374_v33 = vmul.f32 %v991_v49, %v357_v51  ;;  %v427_v35 = vmul.f32 %v377_v14, %v287_v19 }
  0xcf   : > { %v379_v27 = vadd.f32 %v373_v12, %v339_v17  ;;  %v380_v53 = vadd.f32 %v374_v33, %v340_v39 }
  0xd0   : > { %v361_v0 = vpop.permute.xlu1 %360  ;;  %v365_v1 = vpop.permute.xlu0 %364 }
  0xd1   : > { %v375_v15 = vmul.f32 %v991_v49, %v361_v0  ;;  %v429_v52 = vmul.f32 %v379_v27, %v289_v32  ;;  %v376_v56 = vmul.f32 %v991_v49, %v365_v1  ;;  %v430_v49 = vmul.f32 %v380_v53, %v290_v48 }
  0xd3   : > { %v381_v24 = vadd.f32 %v375_v15, %v341_v28  ;;  %v382_v0 = vadd.f32 %v376_v56, %v342_v60 }
  0xd5   : > { %v385_v21 = vpop.permute.xlu1 %384  ;;  %v389_v22 = vpop.permute.xlu0 %388  ;;  %v431_v55 = vmul.f32 %v381_v24, %v291_v42  ;;  %v432_v4 = vmul.f32 %v382_v0, %v292_v2 }
  0xd6   : > { %v411_v23 = vmul.f32 %v1003_v9, %v385_v21  ;;  %v412_v29 = vmul.f32 %v1003_v9, %v389_v22 }
  0xd8   : > { %v421_v36 = vadd.f32 %v420_v16, %v411_v23  ;;  %v422_v38 = vadd.f32 %v420_v16, %v412_v29 }
  0xd9   : > { %v393_v43 = vpop.permute.xlu1 %392  ;;  %v401_v45 = vpop.permute.xlu0 %400 }
  0xda   : > { %v433_v46 = vadd.f32 %v427_v35, %v421_v36  ;;  %v434_v47 = vadd.f32 %v428_v30, %v422_v38  ;;  %v413_v50 = vmul.f32 %v1003_v9, %v393_v43  ;;  %v415_v51 = vmul.f32 %v1003_v9, %v401_v45 }
  0xdc   : > { %439 = vst [vmem:[%s222_s21] sm:$0xff] %v433_v46  ;;  %440 = vst [vmem:[%s222_s21 + $0x8] sm:$0xff] %v434_v47  ;;  %v423_v34 = vadd.f32 %v420_v16, %v413_v50  ;;  %v425_v31 = vadd.f32 %v420_v16, %v415_v51 }
  0xdd   : > { %v397_v58 = vpop.permute.xlu1 %396 }
  0xde   : > { %v435_v61 = vadd.f32 %v429_v52, %v423_v34  ;;  %v437_v62 = vadd.f32 %v431_v55, %v425_v31  ;;  %v414_v63 = vmul.f32 %v1003_v9, %v397_v58 }
  0xe0   : > { %441 = vst [vmem:[%s222_s21 + $0x10] sm:$0xff] %v435_v61  ;;  %443 = vst [vmem:[%s222_s21 + $0x20] sm:$0xff] %v437_v62  ;;  %v424_v1 = vadd.f32 %v420_v16, %v414_v63 }
  0xe1   : > { %v405_v37 = vpop.permute.xlu1 %404 }
  0xe2   : > { %v436_v3 = vadd.f32 %v430_v49, %v424_v1  ;;  %v416_v59 = vmul.f32 %v1003_v9, %v405_v37 }
  0xe4   : > { %442 = vst [vmem:[%s222_s21 + $0x18] sm:$0xff] %v436_v3  ;;  %v426_v5 = vadd.f32 %v420_v16, %v416_v59 }
  0xe6   : > { %v438_v44 = vadd.f32 %v432_v4, %v426_v5 }
  0xe8   : > { %444 = vst [vmem:[%s222_s21 + $0x28] sm:$0xff] %v438_v44 }
  0xe9   : > { %719 = shalt.err (!%p716_p4)
}
  0xea   : > { %s720_s29 = scalar_lea.hbm %s1047_s10, 768  ;;  %s724_s6 = scalar_lea.hbm %s1099_s3, 1536 }
  0xeb   : > { %p721_p6 = scmp.ne.s32.totalorder %s1047_s10, %s720_s29  ;;  %p725_p12 = scmp.lt.u32.totalorder %s1047_s10, %s1099_s3 }
  0xec   : > { %p726_p1 = scmp.lt.u32.totalorder %s724_s6, %s720_s29  ;;  %p728_p8 = scmp.lt.u32.totalorder %s720_s29, %s1047_s10 }
  0xed   : > { %p722_p7 = pnand %p721_p6, %p1107_p9 }
  0xee   : > { %p727_p3 = por %p726_p1, %p725_p12 }
  0xef   : > { %p723_p10 = pneg %p722_p7 }
  0xf0   : > { %p729_p11 = por %p728_p8, %p727_p3 }
  0xf2   : > { %p730_p0 = pnand %p729_p11, %p723_p10 }
  0xf4   : > { %733 = shalt.err (!%p730_p0)
}
  0xf5   : > { %s797_s21 = smov 128   ;;  %s798_s4 = smov 8  }
  0xf6   : > { %579 = dma.vmem_to_hbm [thread:$0]  (%p1107_p9), %s1042_s18, 768, %s1047_s10, %s446_s22, %s797_s21, %s797_s21, %s798_s4  }
  0xf7 PF: > { %s476_s7 = sand.u32 1, %s768_s12   ;;  %p1108_p5 = scmp.ne.s32.totalorder %s1104_s27, 0 }
  0xf8   : > { %p1109_p13 = scmp.ge.s32.totalorder %s788_s17, 2  ;;  %s477_s9 = scalar_lea.sflag [#allocation4], %s476_s7 }
  0xfa   : > { %p586_p2 = pnand %p1109_p13, %p1108_p5 }
  0xfc   : > { %763 = dma.done.wait (!%p586_p2), %s477_s9, 768  }
  0xfd   : > { %765 = vsyncadd (!%p586_p2), %s477_s9, 4294966528  ;;  %s19_s17 = sadd.s32 1, %s788_s17   ;;  %s1110_s12 = smov %s772_s13 }
  0xfe   : > { %p16_p4 = scmp.ge.s32.totalorder %s19_s17, 4   ;;  %s1111_s13 = smov %s776_s14 }
  0xff   : > { %s1112_s14 = smov %s875_s26  ;;  %s1113_s15 = smov %s784_s16 }
 0x100   : > { %s1114_s16 = smov %s1116_s20  ;;  %18 = sbr.rel (!%p16_p4) target bundleno = 6 (0x6), region = 80 }
 0x107   :  { %482 = vsyncpa [#allocation3], 1 }
 0x108   :  { %484 = vsyncpa [#allocation3 + $0x1], 1 }
 0x109   :  { %485 = vsyncpa [#allocation4], 1 }
 0x10a   :  { %487 = vsyncpa [#allocation4 + $0x1], 1 }

</bundles_post_ra>
